<compile_context>
chip_gen: v6e
topology: v6e:2x2x1
jax: 0.10.0
libtpu: 0.0.40
codegen_flags: <defaults>
</compile_context>

<pallas_src>
import functools

import jax
import jax.numpy as jnp
from jax.experimental import pallas as pl
from jax.experimental.pallas import tpu as pltpu


# ----------------------------- kernel --------------------------------------


def _bounded_act_kernel(x_ref, o_ref, *, mode, a, b):
    x = x_ref[...].astype(jnp.float32)
    if mode == "sigmoid":
        # lb + scale*sigmoid(x) == a + b*tanh(x/2); single EUP op per element.
        y = a + b * jnp.tanh(0.5 * x)
    elif mode == "softplus":
        # softplus(x) = max(x, 0) + log1p(exp(-|x|))   (matches F.softplus, beta=1)
        y = a + jnp.maximum(x, 0.0) + jnp.log1p(jnp.exp(-jnp.abs(x)))
    else:
        raise ValueError(f"unknown mode: {mode}")
    o_ref[...] = y.astype(o_ref.dtype)


# ----------------------------- wrapper --------------------------------------


def _cdiv(a, b):
    return -(-a // b)


def bounded_act(x, *, activation="sigmoid", lower_bound=None, upper_bound=None,
                symmetric="auto"):
    """Pallas implementation of BoundedAct.forward.

    activation: "sigmoid" or "softplus"
    """
    if symmetric == "auto":
        if activation == "sigmoid":
            symmetric = True
        elif activation == "softplus":
            symmetric = False
        else:
            raise ValueError("activation must be 'sigmoid' or 'softplus'")

    if activation == "sigmoid":
        if lower_bound is None:
            raise ValueError("lower_bound is required for sigmoid")
        lb = float(lower_bound)
        if symmetric:
            # lb + (1-2lb)*sigmoid(x) = 0.5 + 0.5*(1-2lb)*tanh(x/2)
            a, b = 0.5, 0.5 * (1.0 - 2.0 * lb)
        else:
            if upper_bound is None:
                raise ValueError("upper_bound is required for non-symmetric sigmoid")
            ub = float(upper_bound)
            # lb + (ub-lb)*sigmoid(x) = (lb+ub)/2 + (ub-lb)/2 * tanh(x/2)
            a, b = 0.5 * (lb + ub), 0.5 * (ub - lb)
        mode = "sigmoid"
    elif activation == "softplus":
        if symmetric:
            raise ValueError("Softplus is not symmetric")
        if lower_bound is None:
            raise ValueError("lower_bound is required for softplus")
        a, b = float(lower_bound), 0.0
        mode = "softplus"
    else:
        raise ValueError("activation must be 'sigmoid' or 'softplus'")

    orig_shape = x.shape
    n = x.size
    lanes = 128
    itemsize = jnp.dtype(x.dtype).itemsize
    # sublane packing: 4B -> 8 rows, 2B -> 16 rows, 1B -> 32 rows
    pack = 8 * max(1, 4 // itemsize)

    # ~2 MiB per block per buffer: well up the measured HBM roofline, and with
    # double-buffered input + output (~8 MiB scoped VMEM) comfortably inside
    # v5e/v6e defaults and v7x's 64 MiB physical VMEM.
    target_block_bytes = 2 * 1024 * 1024
    target_rows = max(pack, target_block_bytes // (lanes * itemsize))

    rows_needed = _cdiv(n, lanes)
    rows_aligned = _cdiv(rows_needed, pack) * pack
    if rows_aligned > target_rows:
        block_rows = target_rows
    else:
        # Small/medium input: one or two full blocks.  Use two when there is
        # enough work so both v7x TensorCores get a share of the grid.
        num_blocks = 2 if rows_aligned >= 4 * pack else 1
        block_rows = _cdiv(_cdiv(rows_aligned, num_blocks), pack) * pack

    block_elems = block_rows * lanes
    padded = _cdiv(n, block_elems) * block_elems

    x_flat = x.reshape(-1)
    if padded != n:
        # Only touch HBM with an extra pad op when the size is not already a
        # whole number of blocks.
        x_flat = jnp.pad(x_flat, (0, padded - n))
    rows = padded // lanes
    x2d = x_flat.reshape(rows, lanes)

    grid = (rows // block_rows,)
    kernel = functools.partial(_bounded_act_kernel, mode=mode, a=a, b=b)

    out2d = pl.pallas_call(
        kernel,
        out_shape=jax.ShapeDtypeStruct((rows, lanes), x.dtype),
        grid_spec=pltpu.PrefetchScalarGridSpec(
            num_scalar_prefetch=0,
            grid=grid,
            in_specs=[pl.BlockSpec((block_rows, lanes), lambda i: (i, 0))],
            out_specs=pl.BlockSpec((block_rows, lanes), lambda i: (i, 0)),
        ),
        compiler_params=pltpu.CompilerParams(
            dimension_semantics=("parallel",),
            vmem_limit_bytes=32 * 1024 * 1024,
        ),
    )(x2d)

    out_flat = out2d.reshape(-1)
    if padded != n:
        out_flat = out_flat[:n]
    return out_flat.reshape(orig_shape)


# ----------------------------- reference ------------------------------------


def bounded_act_ref(x, *, activation, lower_bound=None, upper_bound=None,
                    symmetric="auto"):
    if symmetric == "auto":
        symmetric = activation == "sigmoid"
    xf = x.astype(jnp.float32)
    if activation == "sigmoid":
        s = jax.nn.sigmoid(xf)
        if symmetric:
            return (lower_bound + (1.0 - 2.0 * lower_bound) * s).astype(x.dtype)
        return (lower_bound + (upper_bound - lower_bound) * s).astype(x.dtype)
    return (lower_bound + jax.nn.softplus(xf)).astype(x.dtype)


# ----------------------------- main ------------------------------------------


if __name__ == "__main__":
    key = jax.random.PRNGKey(0)
    # NCHW input like the PyTorch module would typically see
    x = jax.random.normal(key, (2, 4, 16, 16), dtype=jnp.float32) * 3.0

    # Sigmoid, symmetric='auto' (-> True), lower_bound=0.1
    y1 = bounded_act(x, activation="sigmoid", lower_bound=0.1)
    r1 = bounded_act_ref(x, activation="sigmoid", lower_bound=0.1)

    # Sigmoid, non-symmetric, bounds [0.2, 0.9]
    y2 = bounded_act(x, activation="sigmoid", lower_bound=0.2, upper_bound=0.9,
                     symmetric=False)
    r2 = bounded_act_ref(x, activation="sigmoid", lower_bound=0.2,
                         upper_bound=0.9, symmetric=False)

    # Softplus, symmetric='auto' (-> False), lower_bound=0.05
    y3 = bounded_act(x, activation="softplus", lower_bound=0.05)
    r3 = bounded_act_ref(x, activation="softplus", lower_bound=0.05)

    # bf16 input (exercises dtype-aware sublane packing)
    x_bf16 = x.astype(jnp.bfloat16)
    y4 = bounded_act(x_bf16, activation="sigmoid", lower_bound=0.1)
    r4 = bounded_act_ref(x_bf16, activation="sigmoid", lower_bound=0.1)

    # odd-sized input (exercises the pad/slice tail path)
    x_odd = jax.random.normal(jax.random.PRNGKey(1), (3, 5, 7, 11),
                              dtype=jnp.float32) * 3.0
    y5 = bounded_act(x_odd, activation="softplus", lower_bound=0.05)
    r5 = bounded_act_ref(x_odd, activation="softplus", lower_bound=0.05)

    jax.block_until_ready((y1, y2, y3, y4, y5))

    assert y1.shape == x.shape and y2.shape == x.shape and y3.shape == x.shape
    assert y4.shape == x.shape and y5.shape == x_odd.shape
    assert jnp.allclose(y1, r1, atol=1e-5, rtol=1e-5)
    assert jnp.allclose(y2, r2, atol=1e-5, rtol=1e-5)
    assert jnp.allclose(y3, r3, atol=1e-5, rtol=1e-5)
    assert jnp.allclose(y4.astype(jnp.float32), r4.astype(jnp.float32),
                        atol=1e-2, rtol=1e-2)
    assert jnp.allclose(y5, r5, atol=1e-5, rtol=1e-5)

    print("KERNEL_OK")
</pallas_src>

<mosaic_0001>
module attributes {stable_mosaic.version = 11 : i64} {
  func.func @_bounded_act_kernel(%arg0: i32, %arg1: memref<16x128xf32, #tpu.memory_space<vmem>>, %arg2: memref<16x128xf32, #tpu.memory_space<vmem>>) attributes {dimension_semantics = [#tpu.dimension_semantics<parallel>], iteration_bounds = array<i64: 1>, scalar_prefetch = 0 : i64, scratch_operands = 0 : i64, tpu.core_type = #tpu.core_type<tc>, window_params = [{transform_indices = @transform_0, window_bounds = array<i64: 16, 128>}, {transform_indices = @transform_1, window_bounds = array<i64: 16, 128>}]} {
    %c0 = arith.constant 0 : index
    %c0_0 = arith.constant 0 : index
    %0 = vector.load %arg1[%c0, %c0_0] : memref<16x128xf32, #tpu.memory_space<vmem>>, vector<16x128xf32>
    %cst = arith.constant 5.000000e-01 : f32
    %1 = vector.broadcast %cst : f32 to vector<16x128xf32>
    %2 = arith.mulf %1, %0 : vector<16x128xf32>
    %3 = math.tanh %2 : vector<16x128xf32>
    %cst_1 = arith.constant 4.000000e-01 : f32
    %4 = vector.broadcast %cst_1 : f32 to vector<16x128xf32>
    %5 = arith.mulf %4, %3 : vector<16x128xf32>
    %cst_2 = arith.constant 5.000000e-01 : f32
    %6 = vector.broadcast %cst_2 : f32 to vector<16x128xf32>
    %7 = arith.addf %6, %5 : vector<16x128xf32>
    %c0_3 = arith.constant 0 : index
    %c0_4 = arith.constant 0 : index
    %8 = vector.load %arg2[%c0_3, %c0_4] : memref<16x128xf32, #tpu.memory_space<vmem>>, vector<16x128xf32>
    tpu.vector_store %arg2[%c0_3, %c0_4], %7 {strides = array<i32>} : memref<16x128xf32, #tpu.memory_space<vmem>>, vector<16x128xf32>,
    return
  }
  func.func @transform_0(%arg0: i32) -> (i32, i32) {
    %c0_i32 = arith.constant 0 : i32
    %c0_i32_0 = arith.constant 0 : i32
    return %arg0, %c0_i32 : i32, i32
  }
  func.func @transform_1(%arg0: i32) -> (i32, i32) {
    %c0_i32 = arith.constant 0 : i32
    %c0_i32_0 = arith.constant 0 : i32
    return %arg0, %c0_i32 : i32, i32
  }
}

</mosaic_0001>

<bundles_post_ra>
// kernel: tpu_custom_call.1
= control target key start
LH: loop header
LB: loop body
LE: loop exit
PB: predicated region body
PF: predicated region fallthrough
CT: control target
= control target key end

     0   :  { %6 = vsyncpa [#allocation3], 0  ;;  %s130_s0 = inlined_call_operand.hbm [shape: f32[16,128], index: 0, kind: input, shape index: {}]   ;;  %s131_s1 = inlined_call_operand.hbm [shape: f32[16,128], index: 1, kind: output, shape index: {}]  }
   0x1   :  { %7 = vsyncpa [#allocation4], 0  ;;  %s104_s6 = smov [#allocation2]  }
   0x2   :  { %s13_s7 = sshll.u32 %s104_s6, 4  ;;  %s14_s7 = int_to_ptr.vmem [resolvable:$true] %s13_s7 }
   0x3   :  { %s68_s8 = scalar_lea.vmem %s14_s7, 256  ;;  %p73_p1 = scmp.lt.s32.totalorder %s14_s7, %s14_s7 }
   0x4   :  { %p69_p0 = scmp.ne.s32.totalorder %s14_s7, %s68_s8  ;;  %p74_p2 = scmp.lt.s32.totalorder %s68_s8, %s68_s8 }
   0x6   :  { %p75_p3 = por %p74_p2, %p73_p1 }
   0x8   :  { %p76_p4 = pnand %p75_p3, %p69_p0 }
   0xa   :  { %79 = shalt.err (!%p76_p4)
}
   0xb   :  { %s105_s9 = smov 128   ;;  %s106_s10 = smov 8  }
   0xc   :  { %19 = dma.hbm_to_vmem [thread:$0]  %s130_s0, 256, %s14_s7, [#allocation3], %s105_s9, %s105_s9, %s106_s10  }
   0xd   :  { %100 = dma.done.wait [#allocation3], 256  }
   0xe   :  { %101 = vsyncadd [#allocation3], 4294967040  ;;  %v23_v0 = vld [vmem:[#allocation2] sm:$0xff]  ;;  %v24_v1 = vld [vmem:[#allocation2 + $0x8] sm:$0xff]  ;;  %s107_s13 = smov [#allocation5]  }
   0xf   :  { %v25_v2 = vmul.f32 0.5, %v23_v0  ;;  %v26_v3 = vmul.f32 0.5, %v24_v1  ;;  %s40_s14 = sshll.u32 %s107_s13, 4  ;;  %s41_s14 = int_to_ptr.vmem [resolvable:$true] %s40_s14 }
  0x10   :  { %s80_s0 = scalar_lea.vmem %s41_s14, 256  ;;  %p85_p6 = scmp.lt.s32.totalorder %s41_s14, %s41_s14 }
  0x11   :  { %56 = vtanh.f32 %v25_v2  ;;  %p81_p5 = scmp.ne.s32.totalorder %s41_s14, %s80_s0  ;;  %p86_p7 = scmp.lt.s32.totalorder %s80_s0, %s80_s0 }
  0x12   :  { %58 = vtanh.f32 %v26_v3 }
  0x13   :  { %p87_p8 = por %p86_p7, %p85_p6 }
  0x15   :  { %p88_p9 = pnand %p87_p8, %p81_p5 }
  0x1e   :  { %v57_v4 = vpop.eup %56 }
  0x1f   :  { %v59_v5 = vpop.eup %58  ;;  %v29_v6 = vmul.f32 0.4, %v57_v4 }
  0x20   :  { %v30_v7 = vmul.f32 0.4, %v59_v5 }
  0x21   :  { %v31_v8 = vadd.f32 0.5, %v29_v6 }
  0x22   :  { %v32_v9 = vadd.f32 0.5, %v30_v7 }
  0x23   :  { %33 = vst [vmem:[#allocation5] sm:$0xff] %v31_v8 }
  0x24   :  { %34 = vst [vmem:[#allocation5 + $0x8] sm:$0xff] %v32_v9 }
  0x25   :  { %91 = shalt.err (!%p88_p9)
}
  0x26   :  { %46 = dma.vmem_to_hbm [thread:$0]  %s41_s14, 256, %s131_s1, [#allocation4], %s105_s9, %s105_s9, %s106_s10  }
  0x27   :  { %102 = dma.done.wait [#allocation4], 256  }
  0x28   :  { %103 = vsyncadd [#allocation4], 4294967040 }
  0x29   :  { %50 = vsyncpa [#allocation3], 1 }
  0x2a   :  { %51 = vsyncpa [#allocation4], 1 }

</bundles_post_ra>
